<compile_context>
chip_gen: v7x
topology: tpu7x:2x2x1
jax: 0.10.0
libtpu: 0.0.40
codegen_flags: <defaults>
</compile_context>

<pallas_src>
import functools
import math

import jax
import jax.numpy as jnp
import numpy as np
from jax.experimental import pallas as pl
from jax.experimental.pallas import tpu as pltpu

MAX_SPAN = 255
BN_EPS = 1e-3


def _gelu(x):
    # exact (erf) GELU, matching torch.nn.functional.gelu default
    return 0.5 * x * (1.0 + jax.lax.erf(x * 0.7071067811865476))


# ---------------------------------------------------------------------------
# Pallas kernels
# ---------------------------------------------------------------------------
def _pointwise_kernel(*refs, pre_gelu, post_gelu, has_res, res_gelu):
    if has_res:
        x_ref, w_ref, sc_ref, sh_ref, r_ref, o_ref = refs
    else:
        x_ref, w_ref, sc_ref, sh_ref, o_ref = refs
        r_ref = None
    x = x_ref[...].astype(jnp.float32)
    if pre_gelu:
        x = _gelu(x)
    y = jnp.dot(x.astype(jnp.bfloat16), w_ref[...],
                preferred_element_type=jnp.float32)
    y = y * sc_ref[...] + sh_ref[...]
    if post_gelu:
        y = _gelu(y)
    if has_res:
        r = r_ref[...].astype(jnp.float32)
        if res_gelu:
            r = _gelu(r)
        y = y + r
    o_ref[...] = y.astype(o_ref.dtype)


def pointwise_conv_bn(x2d, w, scale, shift, *, pre_gelu=False, post_gelu=False,
                      residual=None, res_gelu=False, out_dtype=jnp.bfloat16):
    """Fused (optional GELU) -> 1x1 conv (no bias) -> eval-BN affine -> (optional
    GELU) -> (optional residual add).  bf16 MXU operands, f32 accumulation."""
    M, Cin = x2d.shape
    Cout = w.shape[1]
    tm = M if M <= 512 else 512            # big row tiles; cdiv handles remainders
    grid = (pl.cdiv(M, tm),)
    scale2 = scale.reshape(1, Cout).astype(jnp.float32)
    shift2 = shift.reshape(1, Cout).astype(jnp.float32)
    in_specs = [
        pl.BlockSpec((tm, Cin), lambda i: (i, 0)),
        pl.BlockSpec((Cin, Cout), lambda i: (0, 0)),
        pl.BlockSpec((1, Cout), lambda i: (0, 0)),
        pl.BlockSpec((1, Cout), lambda i: (0, 0)),
    ]
    args = [x2d.astype(jnp.bfloat16), w.astype(jnp.bfloat16), scale2, shift2]
    if residual is not None:
        in_specs.append(pl.BlockSpec((tm, Cout), lambda i: (i, 0)))
        args.append(residual.astype(jnp.bfloat16))
    kernel = functools.partial(_pointwise_kernel, pre_gelu=pre_gelu,
                               post_gelu=post_gelu,
                               has_res=residual is not None, res_gelu=res_gelu)
    return pl.pallas_call(
        kernel,
        out_shape=jax.ShapeDtypeStruct((M, Cout), out_dtype),
        grid=grid,
        in_specs=in_specs,
        out_specs=pl.BlockSpec((tm, Cout), lambda i: (i, 0)),
        compiler_params=pltpu.CompilerParams(dimension_semantics=("parallel",)),
    )(*args)


def _axial_attn_kernel(x_ref, w_ref, qsc_ref, qsh_ref, qr_ref, kr_ref, vr_ref,
                       ssc_ref, obn_ref, o_ref, *, nh, dk, dv, Kd, Vd, pre_gelu):
    """Fused qkv projection + BN + axial attention for TB sequences."""
    TB, L, Cin = x_ref.shape
    x = x_ref[...].reshape(TB * L, Cin).astype(jnp.float32)
    if pre_gelu:
        x = _gelu(x)
    # qkv 1x1 conv (MXU, bf16 operands, f32 accumulation) + folded BN
    qkv = jnp.dot(x.astype(jnp.bfloat16), w_ref[...],
                  preferred_element_type=jnp.float32)
    qkv = qkv * qsc_ref[...] + qsh_ref[...]           # (TB*L, 2Kd+Vd) f32
    qkv = qkv.reshape(TB, L, 2 * Kd + Vd)

    qr = qr_ref[...].astype(jnp.float32)              # (L, L, dk)
    kr = kr_ref[...].astype(jnp.float32)              # (L, L, dk)
    vr = vr_ref[...].astype(jnp.float32)              # (L, L, dv)

    for h in range(nh):
        s_content = ssc_ref[h]                        # per-head BN-sim scales (SMEM)
        s_qrpe = ssc_ref[nh + h]
        s_krpe = ssc_ref[2 * nh + h]
        q = qkv[:, :, h * dk:(h + 1) * dk]                      # (TB, L, dk)
        k = qkv[:, :, Kd + h * dk:Kd + (h + 1) * dk]            # (TB, L, dk)
        v = qkv[:, :, 2 * Kd + h * dv:2 * Kd + (h + 1) * dv]    # (TB, L, dv)

        # content similarity on the MXU (scale folded into q)
        content = jnp.einsum('bld,bmd->blm',
                             (q * s_content).astype(jnp.bfloat16),
                             k.astype(jnp.bfloat16),
                             preferred_element_type=jnp.float32)  # (TB, L, L)
        # RPE similarities (per-head; scales folded into q/k).
        # TODO(synk): replace with MXU contractions / flash-style key tiling at
        #             production L to keep the temporaries out of VMEM.
        q_rpe = jnp.sum((q * s_qrpe)[:, :, None, :] * qr[None, :, :, :], axis=-1)
        k_rpe = jnp.sum((k * s_krpe)[:, None, :, :] * kr[None, :, :, :], axis=-1)
        # per-head BN shifts on the logits are softmax-invariant -> dropped
        logits = content + q_rpe + k_rpe

        m = jnp.max(logits, axis=-1, keepdims=True)
        e = jnp.exp(logits - m)
        w = e / jnp.sum(e, axis=-1, keepdims=True)              # (TB, L, L)

        rc = jnp.einsum('blm,bme->ble', w.astype(jnp.bfloat16),
                        v.astype(jnp.bfloat16),
                        preferred_element_type=jnp.float32)     # (TB, L, dv)
        rr = jnp.sum(w[:, :, :, None] * vr[None, :, :, :], axis=2)

        osc0 = obn_ref[0:1, h * dv:(h + 1) * dv]                # (1, dv)
        osc1 = obn_ref[1:2, h * dv:(h + 1) * dv]
        osh = obn_ref[2:3, h * dv:(h + 1) * dv]
        out_h = rc * osc0 + rr * osc1 + osh                     # (TB, L, dv)
        o_ref[:, :, h * dv:(h + 1) * dv] = out_h.astype(o_ref.dtype)


def _pick_tb(b):
    for t in (8, 4, 2, 1):
        if b % t == 0:
            return t
    return 1


def axial_attention_1d(x_bls, p, *, pre_gelu=False):
    """One AxialAttention layer (eval-mode BN).  x_bls: (B, L, Cin) -> (B, L, Vd)."""
    B, L, Cin = x_bls.shape
    nh, Kd, Vd = p['num_heads'], p['Kd'], p['Vd']
    dk, dv = Kd // nh, Vd // nh
    Cq = 2 * Kd + Vd
    TB = _pick_tb(B)

    qsc = p['qkv_scale'].reshape(1, Cq).astype(jnp.float32)
    qsh = p['qkv_shift'].reshape(1, Cq).astype(jnp.float32)
    ssc = p['sim_scale'].astype(jnp.float32)                    # (3*nh,) -> SMEM
    obn = jnp.stack([p['out_scale'][:Vd], p['out_scale'][Vd:],
                     p['out_shift'][:Vd] + p['out_shift'][Vd:]]).astype(jnp.float32)

    kernel = functools.partial(_axial_attn_kernel, nh=nh, dk=dk, dv=dv,
                               Kd=Kd, Vd=Vd, pre_gelu=pre_gelu)
    return pl.pallas_call(
        kernel,
        out_shape=jax.ShapeDtypeStruct((B, L, Vd), jnp.bfloat16),
        grid=(B // TB,),
        in_specs=[
            pl.BlockSpec((TB, L, Cin), lambda i: (i, 0, 0)),
            pl.BlockSpec((Cin, Cq), lambda i: (0, 0)),
            pl.BlockSpec((1, Cq), lambda i: (0, 0)),
            pl.BlockSpec((1, Cq), lambda i: (0, 0)),
            pl.BlockSpec((L, L, dk), lambda i: (0, 0, 0)),
            pl.BlockSpec((L, L, dk), lambda i: (0, 0, 0)),
            pl.BlockSpec((L, L, dv), lambda i: (0, 0, 0)),
            pl.BlockSpec(memory_space=pltpu.MemorySpace.SMEM),
            pl.BlockSpec((3, Vd), lambda i: (0, 0)),
        ],
        out_specs=pl.BlockSpec((TB, L, Vd), lambda i: (i, 0, 0)),
        compiler_params=pltpu.CompilerParams(dimension_semantics=("parallel",)),
    )(x_bls.astype(jnp.bfloat16), p['w_qkv'].astype(jnp.bfloat16), qsc, qsh,
      p['q_rpe'].astype(jnp.bfloat16), p['k_rpe'].astype(jnp.bfloat16),
      p['v_rpe'].astype(jnp.bfloat16), ssc, obn)


# ---------------------------------------------------------------------------
# Module-level glue
# ---------------------------------------------------------------------------
def axial_attention_2d(x_nhwc, p_h, p_w, *, pre_gelu_h):
    N, H, W, C = x_nhwc.shape
    Vd = p_h['Vd']
    # height axis: sequences along H, batch N*W
    xh = x_nhwc.transpose(0, 2, 1, 3).reshape(N * W, H, C)
    xh = axial_attention_1d(xh, p_h, pre_gelu=pre_gelu_h)
    xh = xh.reshape(N, W, H, Vd).transpose(0, 2, 1, 3)          # (N, H, W, Vd)
    # width axis: sequences along W, batch N*H (no transpose needed)
    xw = axial_attention_1d(xh.reshape(N * H, W, Vd), p_w, pre_gelu=False)
    return xw.reshape(N, H, W, Vd)


def single_block(x_nhwc, p):
    N, H, W, C = x_nhwc.shape
    M = N * H * W
    x2 = x_nhwc.reshape(M, C)
    c1 = p['conv1']
    C1 = c1['w'].shape[1]
    if p['shortcut'] is not None:
        s = p['shortcut']
        # fused GELU(x) @ [W_conv1 | W_shortcut] + BN affine (single pass over x)
        w_cat = jnp.concatenate([c1['w'], s['w']], axis=1)
        sc_cat = jnp.concatenate([c1['scale'], s['scale']])
        sh_cat = jnp.concatenate([c1['shift'], s['shift']])
        stem = pointwise_conv_bn(x2, w_cat, sc_cat, sh_cat, pre_gelu=True)
        h1, res = stem[:, :C1], stem[:, C1:]
        res_gelu = False
    else:
        h1 = pointwise_conv_bn(x2, c1['w'], c1['scale'], c1['shift'], pre_gelu=True)
        res, res_gelu = x2.astype(jnp.bfloat16), True   # shortcut = gelu(x), redone in-kernel
    # conv1's GELU is applied inside the H-axis attention kernel (pre_gelu_h=True)
    h1 = h1.reshape(N, H, W, C1)
    attn = axial_attention_2d(h1, p['attn_h'], p['attn_w'], pre_gelu_h=True)
    Vd = attn.shape[-1]
    out = pointwise_conv_bn(attn.reshape(M, Vd), p['conv3']['w'],
                            p['conv3']['scale'], p['conv3']['shift'],
                            pre_gelu=True, residual=res, res_gelu=res_gelu)
    return out.reshape(N, H, W, -1)


def block_group(x_nhwc, params_list):
    x = x_nhwc.astype(jnp.bfloat16)
    for p in params_list:
        x = single_block(x, p)
    return x.astype(jnp.float32)


# ---------------------------------------------------------------------------
# Deterministic synthetic parameters (shapes follow the module __init__)
# ---------------------------------------------------------------------------
def init_bn(key, c):
    k1, k2, k3, k4 = jax.random.split(key, 4)
    gamma = 1.0 + 0.1 * jax.random.normal(k1, (c,), jnp.float32)
    beta = 0.1 * jax.random.normal(k2, (c,), jnp.float32)
    mean = 0.1 * jax.random.normal(k3, (c,), jnp.float32)
    var = jnp.abs(1.0 + 0.1 * jax.random.normal(k4, (c,), jnp.float32)) + 0.1
    scale = gamma / jnp.sqrt(var + BN_EPS)
    shift = beta - mean * scale
    return scale, shift


def init_conv(key, cin, cout, std=None):
    if std is None:
        std = math.sqrt(1.0 / cin)
    return std * jax.random.normal(key, (cin, cout), jnp.float32)


def make_rpe(key, L, depth):
    emb = 0.2 * jax.random.normal(key, (2 * MAX_SPAN - 1, depth), jnp.float32)
    dist = jnp.arange(L)[None, :] - jnp.arange(L)[:, None] + (MAX_SPAN - 1)
    return emb[dist.reshape(-1)].reshape(L, L, depth)


def init_axial_attention(key, in_planes, L, Kd, Vd, nh):
    ks = jax.random.split(key, 7)
    dk, dv = Kd // nh, Vd // nh
    p = dict(num_heads=nh, Kd=Kd, Vd=Vd)
    p['w_qkv'] = init_conv(ks[0], in_planes, 2 * Kd + Vd, std=in_planes ** -0.5)
    p['qkv_scale'], p['qkv_shift'] = init_bn(ks[1], 2 * Kd + Vd)
    p['q_rpe'] = make_rpe(ks[2], L, dk)
    p['k_rpe'] = make_rpe(ks[3], L, dk)
    p['v_rpe'] = make_rpe(ks[4], L, dv)
    p['sim_scale'], p['sim_shift'] = init_bn(ks[5], 3 * nh)
    p['out_scale'], p['out_shift'] = init_bn(ks[6], 2 * Vd)
    return p


def init_single_block(key, inplanes, filter_list, query_shape, key_exp, value_exp, nh):
    ks = jax.random.split(key, 8)
    Kd = int(round(filter_list[1] * key_exp))
    Vd = int(round(filter_list[1] * value_exp))
    p = {}
    p['conv1'] = dict(w=init_conv(ks[0], inplanes, filter_list[0]))
    p['conv1']['scale'], p['conv1']['shift'] = init_bn(ks[1], filter_list[0])
    p['attn_h'] = init_axial_attention(ks[2], filter_list[0], query_shape[0], Kd, Vd, nh)
    p['attn_w'] = init_axial_attention(ks[3], Vd, query_shape[1], Kd, Vd, nh)
    p['conv3'] = dict(w=init_conv(ks[4], Vd, filter_list[2]))
    p['conv3']['scale'], p['conv3']['shift'] = init_bn(ks[5], filter_list[2])
    if inplanes != filter_list[-1]:
        p['shortcut'] = dict(w=init_conv(ks[6], inplanes, filter_list[2]))
        p['shortcut']['scale'], p['shortcut']['shift'] = init_bn(ks[7], filter_list[2])
    else:
        p['shortcut'] = None
    return p


# ---------------------------------------------------------------------------
# Pure-JAX reference (same math, no Pallas, f32) for verification
# ---------------------------------------------------------------------------
def _ref_pointwise(x2d, w, scale, shift, pre_gelu=False, post_gelu=False, residual=None):
    x = x2d.astype(jnp.float32)
    if pre_gelu:
        x = _gelu(x)
    y = x @ w
    y = y * scale[None, :] + shift[None, :]
    if post_gelu:
        y = _gelu(y)
    if residual is not None:
        y = y + residual
    return y


def _ref_axial_1d(x_blc, p):
    B, L, Cin = x_blc.shape
    nh, Kd, Vd = p['num_heads'], p['Kd'], p['Vd']
    dk, dv = Kd // nh, Vd // nh
    qkv = _ref_pointwise(x_blc.reshape(B * L, Cin), p['w_qkv'],
                         p['qkv_scale'], p['qkv_shift']).reshape(B, L, -1)
    q = qkv[..., :Kd].reshape(B, L, nh, dk).transpose(0, 2, 1, 3)
    k = qkv[..., Kd:2 * Kd].reshape(B, L, nh, dk).transpose(0, 2, 1, 3)
    v = qkv[..., 2 * Kd:].reshape(B, L, nh, dv).transpose(0, 2, 1, 3)
    content = jnp.einsum('bhld,bhmd->bhlm', q, k)
    qsim = jnp.einsum('bhld,lmd->bhlm', q, p['q_rpe'])
    ksim = jnp.einsum('bhmd,lmd->bhlm', k, p['k_rpe'])
    ssc = p['sim_scale'].reshape(3, nh)
    ssh = p['sim_shift'].reshape(3, nh)
    logits = (content * ssc[0][None, :, None, None] + ssh[0][None, :, None, None]
              + qsim * ssc[1][None, :, None, None] + ssh[1][None, :, None, None]
              + ksim * ssc[2][None, :, None, None] + ssh[2][None, :, None, None])
    w_ = jax.nn.softmax(logits, axis=-1)
    rc = jnp.einsum('bhlm,bhmd->bhld', w_, v)
    rr = jnp.einsum('bhlm,lmd->bhld', w_, p['v_rpe'])
    osc = p['out_scale'].reshape(2, nh, dv)
    osh = p['out_shift'].reshape(2, nh, dv)
    out = (rc * osc[0][None, :, None, :] + rr * osc[1][None, :, None, :]
           + (osh[0] + osh[1])[None, :, None, :])
    return out.transpose(0, 2, 1, 3).reshape(B, L, Vd)


def _ref_single_block(x_nhwc, p):
    N, H, W, C = x_nhwc.shape
    M = N * H * W
    g = _gelu(x_nhwc.reshape(M, C).astype(jnp.float32))
    if p['shortcut'] is not None:
        sc = _ref_pointwise(g, p['shortcut']['w'], p['shortcut']['scale'], p['shortcut']['shift'])
    else:
        sc = g
    h1 = _ref_pointwise(g, p['conv1']['w'], p['conv1']['scale'], p['conv1']['shift'],
                        post_gelu=True).reshape(N, H, W, -1)
    xh = h1.transpose(0, 2, 1, 3).reshape(N * W, H, -1)
    xh = _ref_axial_1d(xh, p['attn_h'])
    Vd = xh.shape[-1]
    xh = xh.reshape(N, W, H, Vd).transpose(0, 2, 1, 3)
    xw = _ref_axial_1d(xh.reshape(N * H, W, Vd), p['attn_w'])
    attn = xw.reshape(N, H, W, Vd)
    out = _ref_pointwise(attn.reshape(M, Vd), p['conv3']['w'], p['conv3']['scale'],
                         p['conv3']['shift'], pre_gelu=True, residual=sc)
    return out.reshape(N, H, W, -1)


def block_group_ref(x_nhwc, params_list):
    for p in params_list:
        x_nhwc = _ref_single_block(x_nhwc, p)
    return x_nhwc


# ---------------------------------------------------------------------------
if __name__ == "__main__":
    key = jax.random.PRNGKey(0)
    N, H, W = 2, 8, 8
    inplanes, base_filter, num_blocks = 48, 32, 2
    num_heads = 4
    # block_type == 'axial' -> filter_list = [base*2, base, base*4]
    filter_list = [base_filter * 2, base_filter, base_filter * 4]

    kx, kp = jax.random.split(key)
    x = 0.5 * jax.random.normal(kx, (N, H, W, inplanes), jnp.float32)  # layout: NHWC

    params = []
    cin = inplanes
    for _ in range(num_blocks):
        kp, kb = jax.random.split(kp)
        params.append(init_single_block(kb, cin, filter_list, [H, W],
                                        key_exp=1, value_exp=2, nh=num_heads))
        cin = filter_list[-1]

    out = block_group(x, params)
    out = jax.block_until_ready(out)

    ref = block_group_ref(x, params)
    np.testing.assert_allclose(np.asarray(out), np.asarray(ref), rtol=5e-2, atol=1e-1)
    assert out.shape == (N, H, W, filter_list[-1])
    print("KERNEL_OK")
</pallas_src>

<mosaic_0001>
module attributes {stable_mosaic.version = 11 : i64} {
  func.func @_pointwise_kernel(%arg0: i32, %arg1: memref<128x48xbf16, #tpu.memory_space<vmem>>, %arg2: memref<48x192xbf16, #tpu.memory_space<vmem>>, %arg3: memref<1x192xf32, #tpu.memory_space<vmem>>, %arg4: memref<1x192xf32, #tpu.memory_space<vmem>>, %arg5: memref<128x192xbf16, #tpu.memory_space<vmem>>) attributes {dimension_semantics = [#tpu.dimension_semantics<parallel>], iteration_bounds = array<i64: 1>, scalar_prefetch = 0 : i64, scratch_operands = 0 : i64, tpu.core_type = #tpu.core_type<tc>, window_params = [{transform_indices = @transform_0, window_bounds = array<i64: 128, 48>}, {pipeline_mode = #tpu.pipeline_mode<synchronous>, transform_indices = @transform_1, window_bounds = array<i64: 48, 192>}, {pipeline_mode = #tpu.pipeline_mode<synchronous>, transform_indices = @transform_2, window_bounds = array<i64: 1, 192>}, {pipeline_mode = #tpu.pipeline_mode<synchronous>, transform_indices = @transform_3, window_bounds = array<i64: 1, 192>}, {transform_indices = @transform_4, window_bounds = array<i64: 128, 192>}]} {
    %c0 = arith.constant 0 : index
    %c0_0 = arith.constant 0 : index
    %0 = vector.load %arg1[%c0, %c0_0] : memref<128x48xbf16, #tpu.memory_space<vmem>>, vector<128x48xbf16>
    %1 = arith.extf %0 : vector<128x48xbf16> to vector<128x48xf32>
    %cst = arith.constant 5.000000e-01 : f32
    %2 = vector.broadcast %cst : f32 to vector<128x48xf32>
    %3 = arith.mulf %2, %1 : vector<128x48xf32>
    %cst_1 = arith.constant 0.707106769 : f32
    %4 = vector.broadcast %cst_1 : f32 to vector<128x48xf32>
    %5 = arith.mulf %1, %4 : vector<128x48xf32>
    %6 = math.erf %5 : vector<128x48xf32>
    %cst_2 = arith.constant 1.000000e+00 : f32
    %7 = vector.broadcast %cst_2 : f32 to vector<128x48xf32>
    %8 = arith.addf %7, %6 : vector<128x48xf32>
    %9 = arith.mulf %3, %8 : vector<128x48xf32>
    %10 = arith.truncf %9 : vector<128x48xf32> to vector<128x48xbf16>
    %c0_3 = arith.constant 0 : index
    %c0_4 = arith.constant 0 : index
    %11 = vector.load %arg2[%c0_3, %c0_4] : memref<48x192xbf16, #tpu.memory_space<vmem>>, vector<48x192xbf16>
    %cst_5 = arith.constant dense<0.000000e+00> : vector<128x192xf32>
    %12 = tpu.matmul %10, %11, %cst_5 {dimension_numbers = #tpu.dot_dimension_numbers<[1], [0], [0], [1], [0, 0, 1, 1], [], []>} : vector<128x48xbf16>, vector<48x192xbf16>, vector<128x192xf32> -> vector<128x192xf32>
    %c0_6 = arith.constant 0 : index
    %c0_7 = arith.constant 0 : index
    %13 = vector.load %arg3[%c0_6, %c0_7] : memref<1x192xf32, #tpu.memory_space<vmem>>, vector<1x192xf32>
    %14 = vector.broadcast %13 : vector<1x192xf32> to vector<128x192xf32>
    %15 = arith.mulf %12, %14 : vector<128x192xf32>
    %c0_8 = arith.constant 0 : index
    %c0_9 = arith.constant 0 : index
    %16 = vector.load %arg4[%c0_8, %c0_9] : memref<1x192xf32, #tpu.memory_space<vmem>>, vector<1x192xf32>
    %17 = vector.broadcast %16 : vector<1x192xf32> to vector<128x192xf32>
    %18 = arith.addf %15, %17 : vector<128x192xf32>
    %19 = arith.truncf %18 : vector<128x192xf32> to vector<128x192xbf16>
    %c0_10 = arith.constant 0 : index
    %c0_11 = arith.constant 0 : index
    %20 = vector.load %arg5[%c0_10, %c0_11] : memref<128x192xbf16, #tpu.memory_space<vmem>>, vector<128x192xbf16>
    tpu.vector_store %arg5[%c0_10, %c0_11], %19 {strides = array<i32>} : memref<128x192xbf16, #tpu.memory_space<vmem>>, vector<128x192xbf16>,
    return
  }
  func.func @transform_0(%arg0: i32) -> (i32, i32) {
    %c0_i32 = arith.constant 0 : i32
    %c0_i32_0 = arith.constant 0 : i32
    return %arg0, %c0_i32 : i32, i32
  }
  func.func @transform_1(%arg0: i32) -> (i32, i32) {
    %c0_i32 = arith.constant 0 : i32
    %c0_i32_0 = arith.constant 0 : i32
    %c0_i32_1 = arith.constant 0 : i32
    return %c0_i32, %c0_i32_0 : i32, i32
  }
  func.func @transform_2(%arg0: i32) -> (i32, i32) {
    %c0_i32 = arith.constant 0 : i32
    %c0_i32_0 = arith.constant 0 : i32
    %c0_i32_1 = arith.constant 0 : i32
    return %c0_i32, %c0_i32_0 : i32, i32
  }
  func.func @transform_3(%arg0: i32) -> (i32, i32) {
    %c0_i32 = arith.constant 0 : i32
    %c0_i32_0 = arith.constant 0 : i32
    %c0_i32_1 = arith.constant 0 : i32
    return %c0_i32, %c0_i32_0 : i32, i32
  }
  func.func @transform_4(%arg0: i32) -> (i32, i32) {
    %c0_i32 = arith.constant 0 : i32
    %c0_i32_0 = arith.constant 0 : i32
    return %arg0, %c0_i32 : i32, i32
  }
}

</mosaic_0001>

<bundles_post_ra>
// kernel: tpu_custom_call.1
= control target key start
LH: loop header
LB: loop body
LE: loop exit
PB: predicated region body
PF: predicated region fallthrough
CT: control target
= control target key end

     0   :  { %v652_v1 = vmov 0   ;;  %vm174_vm0 = vcmask 392192   ;;  %vm496_vm1 = vcmask 1043456   ;;  %vm497_vm2 = vcmask 523268   ;;  %s958_s1 = inlined_call_operand.vmem [shape: bf16[48,192], index: 1, kind: input, shape index: {}]   ;;  %s959_s0 = inlined_call_operand.vmem [shape: bf16[128,48], index: 0, kind: input, shape index: {}]   ;;  %s960_s2 = inlined_call_operand.vmem [shape: f32[1,192], index: 2, kind: input, shape index: {}]   ;;  %s961_s3 = inlined_call_operand.vmem [shape: f32[1,192], index: 3, kind: input, shape index: {}]   ;;  %s962_s4 = inlined_call_operand.vmem [shape: bf16[128,192], index: 4, kind: output, shape index: {}]  }
   0x1   :  { %v611_v0 = vld [vmem:[%s958_s1 + $0x4] ss:$8 sps:$4 sm:$0xff]   ;;  %231 = vmatprep.mubr.bf16.mxu0 %v652_v1  ;;  %271 = vmatprep.mubr.bf16.mxu1 %v652_v1  ;;  %v613_v2 = vld [vmem:[%s958_s1] ss:$8 sps:$4 sm:$0xff]   ;;  %v614_v3 = vld [vmem:[%s958_s1 + $0x14] ss:$8 sps:$4 sm:$0xff]  }
   0x2   :  { %199 = vmatprep.subr.bf16.mxu0 %v611_v0  ;;  %604 = vmatprep.subr.bf16.mxu1 %v611_v0  ;;  %v616_v4 = vld [vmem:[%s958_s1 + $0x10] ss:$8 sps:$4 sm:$0xff]   ;;  %v617_v5 = vld [vmem:[%s958_s1 + $0x24] ss:$8 sps:$4 sm:$0xff]   ;;  %v619_v16 = vld [vmem:[%s958_s1 + $0x20] ss:$8 sps:$4 sm:$0xff]  }
   0x3   :  { %200 = vmatpush1.bf16.msra.mxu0 %v613_v2  ;;  %607 = vmatpush1.bf16.msra.mxu1 %v613_v2  ;;  %v566_v6 = vld [vmem:[%s959_s0] sm:$0xff]   ;;  %v706_v8 = vld [vmem:[%s959_s0 + $0x8] sm:$0xff]   ;;  %v725_v23 = vld [vmem:[%s959_s0 + $0x10] sm:$0xff]  }
   0x4   :  { %201 = vmatprep.subr.bf16.mxu0 %v614_v3  ;;  %605 = vmatprep.subr.bf16.mxu1 %v614_v3  ;;  %v701_v7 = vld [vmem:[%s959_s0 + $0x20] sm:$0xff]   ;;  %v567_v9 = vunpack.c.l.bf16 %v566_v6  ;;  %v568_v10 = vunpack.c.h.bf16 %v566_v6  ;;  %v713_v13 = vld [vmem:[%s959_s0 + $0x28] sm:$0xff]   ;;  %v571_v14 = vunpack.c.l.bf16 %v706_v8  ;;  %v572_v15 = vunpack.c.h.bf16 %v706_v8  ;;  %v730_v25 = vld [vmem:[%s959_s0 + $0x30] sm:$0xff]  }
   0x5   :  { %v583_v11 = vunpack.c.l.bf16 %v701_v7  ;;  %v584_v12 = vunpack.c.h.bf16 %v701_v7  ;;  %v587_v19 = vunpack.c.l.bf16 %v713_v13  ;;  %v588_v20 = vunpack.c.h.bf16 %v713_v13  ;;  %v741_v34 = vld [vmem:[%s959_s0 + $0x18] sm:$0xff]   ;;  %vm819_vm3 = vmor %vm497_vm2, %vm496_vm1 }
   0x6   :  { %v66_v17 = vmul.f32 0.70710677, %v567_v9  ;;  %v67_v18 = vmul.f32 0.70710677, %v568_v10  ;;  %v68_v24 = vmul.f32 0.70710677, %v571_v14  ;;  %v575_v29 = vunpack.c.l.bf16 %v725_v23 }
   0x7   :  { %202 = vmatpush1.bf16.msra.mxu0 %v616_v4  ;;  %608 = vmatpush1.bf16.msra.mxu1 %v616_v4  ;;  %v74_v21 = vmul.f32 0.70710677, %v583_v11  ;;  %v75_v22 = vmul.f32 0.70710677, %v584_v12  ;;  %v69_v26 = vmul.f32 0.70710677, %v572_v15  ;;  %v576_v30 = vunpack.c.h.bf16 %v725_v23 }
   0x8   :  { %203 = vmatprep.subr.bf16.mxu0 %v617_v5  ;;  %606 = vmatprep.subr.bf16.mxu1 %v617_v5  ;;  %620 = verf.f32 %v66_v17  ;;  %v76_v27 = vmul.f32 0.70710677, %v587_v19  ;;  %v77_v28 = vmul.f32 0.70710677, %v588_v20  ;;  %v591_v31 = vunpack.c.l.bf16 %v730_v25  ;;  %v750_v37 = vld [vmem:[%s959_s0 + $0x38] sm:$0xff]  }
   0x9   :  { %622 = verf.f32 %v67_v18  ;;  %v592_v32 = vunpack.c.h.bf16 %v730_v25  ;;  %v70_v33 = vmul.f32 0.70710677, %v575_v29  ;;  %v71_v35 = vmul.f32 0.70710677, %v576_v30 }
   0xa   :  { %624 = verf.f32 %v74_v21  ;;  %v78_v36 = vmul.f32 0.70710677, %v591_v31  ;;  %v579_v39 = vunpack.c.l.bf16 %v741_v34  ;;  %v580_v40 = vunpack.c.h.bf16 %v741_v34 }
   0xb   :  { %204 = vmatpush1.bf16.msra.mxu0 %v619_v16  ;;  %609 = vmatpush1.bf16.msra.mxu1 %v619_v16  ;;  %626 = verf.f32 %v75_v22  ;;  %v79_v38 = vmul.f32 0.70710677, %v592_v32  ;;  %v50_v41 = vmul.f32 0.5, %v567_v9  ;;  %v595_v42 = vunpack.c.l.bf16 %v750_v37 }
   0xc   :  { %628 = verf.f32 %v68_v24  ;;  %v51_v44 = vmul.f32 0.5, %v568_v10  ;;  %v58_v45 = vmul.f32 0.5, %v583_v11  ;;  %v72_v48 = vmul.f32 0.70710677, %v579_v39 }
   0xd   :  { %630 = verf.f32 %v69_v26  ;;  %v596_v49 = vunpack.c.h.bf16 %v750_v37  ;;  %v59_v52 = vmul.f32 0.5, %v584_v12  ;;  %v52_v53 = vmul.f32 0.5, %v571_v14 }
   0xe   :  { %632 = verf.f32 %v76_v27  ;;  %v73_v54 = vmul.f32 0.70710677, %v580_v40  ;;  %v53_v58 = vmul.f32 0.5, %v572_v15  ;;  %v80_v59 = vmul.f32 0.70710677, %v595_v42 }
   0xf   :  { %634 = verf.f32 %v77_v28  ;;  %v60_v63 = vmul.f32 0.5, %v587_v19  ;;  %v61_v0 = vmul.f32 0.5, %v588_v20  ;;  %v81_v5 = vmul.f32 0.70710677, %v596_v49 }
  0x10   :  { %636 = verf.f32 %v70_v33  ;;  %v54_v22 = vmul.f32 0.5, %v575_v29  ;;  %v55_v26 = vmul.f32 0.5, %v576_v30  ;;  %v62_v33 = vmul.f32 0.5, %v591_v31 }
  0x11   :  { %638 = verf.f32 %v71_v35  ;;  %v56_v25 = vmul.f32 0.5, %v579_v39  ;;  %v314_v37 = vlaneseq }
  0x12   :  { %v621_v43 = vpop.eup %620  ;;  %640 = verf.f32 %v78_v36  ;;  %v63_v36 = vmul.f32 0.5, %v592_v32 }
  0x13   :  { %v623_v46 = vpop.eup %622  ;;  %v98_v47 = vadd.f32 1.0, %v621_v43  ;;  %642 = verf.f32 %v79_v38 }
  0x14   :  { %v625_v50 = vpop.eup %624  ;;  %v99_v51 = vadd.f32 1.0, %v623_v46  ;;  %644 = verf.f32 %v72_v48 }
  0x15   :  { %v627_v55 = vpop.eup %626  ;;  %v114_v56 = vmul.f32 %v98_v47, %v50_v41  ;;  %v106_v57 = vadd.f32 1.0, %v625_v50  ;;  %646 = verf.f32 %v73_v54  ;;  %v57_v47 = vmul.f32 0.5, %v580_v40 }
  0x16   :  { %v629_v60 = vpop.eup %628  ;;  %v115_v61 = vmul.f32 %v99_v51, %v51_v44  ;;  %v107_v62 = vadd.f32 1.0, %v627_v55  ;;  %648 = verf.f32 %v80_v59  ;;  %v64_v51 = vmul.f32 0.5, %v595_v42  ;;  %v312_v59 = vld [vmem:[%s960_s2] sm:$0x3] }
  0x17   :  { %v631_v2 = vpop.eup %630  ;;  %v122_v3 = vmul.f32 %v106_v57, %v58_v45  ;;  %v100_v4 = vadd.f32 1.0, %v629_v60  ;;  %650 = verf.f32 %v81_v5 }
  0x18   :  { %v633_v6 = vpop.eup %632  ;;  %v130_v7 = vpack.c.bf16 %v115_v61, %v114_v56  ;;  %v123_v8 = vmul.f32 %v107_v62, %v59_v52  ;;  %v101_v9 = vadd.f32 1.0, %v631_v2  ;;  %v356_v61 = vld [vmem:[%s961_s3] sm:$0x3] }
  0x19   :  { %v635_v10 = vpop.eup %634  ;;  %v108_v11 = vadd.f32 1.0, %v633_v6  ;;  %v116_v14 = vmul.f32 %v100_v4, %v52_v53  ;;  %v65_v53 = vmul.f32 0.5, %v596_v49  ;;  %v315_v49 = vshrl.u32 %v314_v37, 7 }
  0x1a   :  { %v637_v12 = vpop.eup %636  ;;  %525 = vmatmul.mubr.msk.bf16.vlgmr.msra.gmra.mrb[0].mxu0 %vm174_vm0, %v130_v7  ;;  %v134_v13 = vpack.c.bf16 %v123_v8, %v122_v3  ;;  %v117_v15 = vmul.f32 %v101_v9, %v53_v58  ;;  %v109_v16 = vadd.f32 1.0, %v635_v10 }
  0x1b   :  { %v639_v17 = vpop.eup %638  ;;  %241 = vmatprep.mubr.bf16.mxu0 %v652_v1  ;;  %v124_v19 = vmul.f32 %v108_v11, %v60_v63  ;;  %v102_v27 = vadd.f32 1.0, %v637_v12  ;;  %v316_v58 = vsub.s32 0, %v315_v49  ;;  %v320_v60 = vsub.s32 1, %v315_v49 }
  0x1c   :  { %v641_v18 = vpop.eup %640  ;;  %529 = vmatmul.mubr.msk.bf16.vlgmr.msra.gmra.mrb[0].mxu1 %vm174_vm0, %v134_v13  ;;  %v125_v20 = vmul.f32 %v109_v16, %v61_v0  ;;  %v131_v24 = vpack.c.bf16 %v117_v15, %v116_v14  ;;  %v103_v28 = vadd.f32 1.0, %v639_v17 }
  0x1d   :  { %v643_v21 = vpop.eup %642  ;;  %281 = vmatprep.mubr.bf16.mxu1 %v652_v1  ;;  %v110_v38 = vadd.f32 1.0, %v641_v18  ;;  %v118_v29 = vmul.f32 %v102_v27, %v54_v22  ;;  %v802_v62 = vrot.slane %v312_v59, %v316_v58  ;;  %v806_v63 = vrot.slane %v356_v61, %v316_v58 }
  0x1e   :  { %v135_v35 = vpack.c.bf16 %v125_v20, %v124_v19  ;;  %v111_v41 = vadd.f32 1.0, %v643_v21  ;;  %v645_v43 = vpop.eup %644  ;;  %v119_v45 = vmul.f32 %v103_v28, %v55_v26  ;;  %v808_v2 = vrot.slane %v356_v61, %v320_v60 }
  0x1f   :  { %v647_v44 = vpop.eup %646  ;;  %v126_v23 = vmul.f32 %v110_v38, %v62_v33  ;;  %v104_v48 = vadd.f32 1.0, %v645_v43 }
  0x20   :  { %v649_v46 = vpop.eup %648  ;;  %v127_v30 = vmul.f32 %v111_v41, %v63_v36  ;;  %v132_v32 = vpack.c.bf16 %v119_v45, %v118_v29  ;;  %v105_v50 = vadd.f32 1.0, %v647_v44 }
  0x21   :  { %v651_v31 = vpop.eup %650  ;;  %v112_v54 = vadd.f32 1.0, %v649_v46  ;;  %v120_v56 = vmul.f32 %v104_v48, %v56_v25 }
  0x22   :  { %526 = vmatmul.mubr.msk.bf16.gmra.mrb[4].mxu0 %vm174_vm0, %v131_v24  ;;  %v136_v52 = vpack.c.bf16 %v127_v30, %v126_v23  ;;  %v113_v55 = vadd.f32 1.0, %v651_v31  ;;  %v121_v57 = vmul.f32 %v105_v50, %v57_v47 }
  0x23   :  { %251 = vmatprep.mubr.bf16.mxu0 %v652_v1  ;;  %v128_v34 = vmul.f32 %v112_v54, %v64_v51 }
  0x24   :  { %530 = vmatmul.mubr.msk.bf16.gmra.mrb[4].mxu1 %vm174_vm0, %v135_v35  ;;  %v129_v39 = vmul.f32 %v113_v55, %v65_v53  ;;  %v133_v40 = vpack.c.bf16 %v121_v57, %v120_v56 }
  0x25   :  { %291 = vmatprep.mubr.bf16.mxu1 %v652_v1 }
  0x26   :  { %v137_v42 = vpack.c.bf16 %v129_v39, %v128_v34 }
  0x2a   :  { %527 = vmatmul.mubr.msk.bf16.gmra.mrb[8].mxu0 %vm174_vm0, %v132_v32 }
  0x2b   :  { %261 = vmatprep.mubr.bf16.mxu0 %v652_v1 }
  0x2c   :  { %531 = vmatmul.mubr.msk.bf16.gmra.mrb[8].mxu1 %vm174_vm0, %v136_v52 }
  0x2d   :  { %301 = vmatprep.mubr.bf16.mxu1 %v652_v1  ;;  %v804_v1 = vrot.slane %v312_v59, %v320_v60 }
  0x32   :  { %528 = vmatmul.mubr.msk.bf16.gmra.mrb[12].mxu0 %vm174_vm0, %v133_v40 }
  0x34   :  { %532 = vmatmul.mubr.msk.bf16.gmra.mrb[12].mxu1 %vm174_vm0, %v137_v42 }
  0xed   :  { %v233_v0 = vpop.f32.mrb[0].mxu0 }
  0xee   :  { %v324_v3 = vmul.f32 %v802_v62, %v233_v0  ;;  %v235_v4 = vpop.f32.mrb[1].mxu0 }
  0xef   :  { %v273_v5 = vpop.f32.mrb[0].mxu1  ;;  %v325_v6 = vmul.f32 %v804_v1, %v235_v4  ;;  %v237_v7 = vpop.f32.mrb[2].mxu0 }
  0xf0   :  { %v368_v8 = vadd.f32 %v806_v63, %v324_v3  ;;  %v340_v9 = vmul.f32 %v802_v62, %v273_v5  ;;  %v275_v10 = vpop.f32.mrb[1].mxu1  ;;  %v326_v11 = vmul.f32 %v802_v62, %v237_v7  ;;  %v239_v12 = vpop.f32.mrb[3].mxu0 }
  0xf1   :  { %v369_v13 = vadd.f32 %v808_v2, %v325_v6  ;;  %v341_v14 = vmul.f32 %v804_v1, %v275_v10  ;;  %v277_v15 = vpop.f32.mrb[2].mxu1  ;;  %v327_v16 = vmul.f32 %v804_v1, %v239_v12 }
  0xf2   :  { %v384_v17 = vadd.f32 %v806_v63, %v340_v9  ;;  %v370_v19 = vadd.f32 %v806_v63, %v326_v11  ;;  %v342_v20 = vmul.f32 %v802_v62, %v277_v15  ;;  %v279_v21 = vpop.f32.mrb[3].mxu1 }
  0xf3   :  { %v549_v22 = vpack.c.bf16 %v369_v13, %v368_v8  ;;  %v385_v24 = vadd.f32 %v808_v2, %v341_v14  ;;  %v371_v26 = vadd.f32 %v808_v2, %v327_v16  ;;  %v343_v27 = vmul.f32 %v804_v1, %v279_v21 }
  0xf4   :  { %v386_v28 = vadd.f32 %v806_v63, %v342_v20 }
  0xf5   :  { %499 = vst.msk [vmem:[%s962_s4] sm:$0xff] %vm819_vm3, %v549_v22  ;;  %v557_v33 = vpack.c.bf16 %v385_v24, %v384_v17  ;;  %v550_v35 = vpack.c.bf16 %v371_v26, %v370_v19  ;;  %v387_v36 = vadd.f32 %v808_v2, %v343_v27  ;;  %v243_v38 = vpop.f32.mrb[4].mxu0 }
  0xf6   :  { %v328_v41 = vmul.f32 %v802_v62, %v243_v38  ;;  %v245_v43 = vpop.f32.mrb[5].mxu0 }
  0xf7   :  { %507 = vst.msk [vmem:[%s962_s4 + $0x40] sm:$0xff] %vm819_vm3, %v557_v33  ;;  %500 = vst.msk [vmem:[%s962_s4 + $0x8] sm:$0xff] %vm819_vm3, %v550_v35  ;;  %v558_v44 = vpack.c.bf16 %v387_v36, %v386_v28  ;;  %v283_v29 = vpop.f32.mrb[4].mxu1  ;;  %v329_v45 = vmul.f32 %v804_v1, %v245_v43  ;;  %v247_v46 = vpop.f32.mrb[6].mxu0 }
  0xf8   :  { %v372_v23 = vadd.f32 %v806_v63, %v328_v41  ;;  %v344_v30 = vmul.f32 %v802_v62, %v283_v29  ;;  %v285_v31 = vpop.f32.mrb[5].mxu1  ;;  %v330_v25 = vmul.f32 %v802_v62, %v247_v46  ;;  %v249_v32 = vpop.f32.mrb[7].mxu0 }
  0xf9   :  { %508 = vst.msk [vmem:[%s962_s4 + $0x48] sm:$0xff] %vm819_vm3, %v558_v44  ;;  %v373_v47 = vadd.f32 %v808_v2, %v329_v45  ;;  %v345_v48 = vmul.f32 %v804_v1, %v285_v31  ;;  %v287_v50 = vpop.f32.mrb[6].mxu1  ;;  %v331_v51 = vmul.f32 %v804_v1, %v249_v32 }
  0xfa   :  { %v388_v52 = vadd.f32 %v806_v63, %v344_v30  ;;  %v374_v53 = vadd.f32 %v806_v63, %v330_v25  ;;  %v346_v54 = vmul.f32 %v802_v62, %v287_v50  ;;  %v289_v55 = vpop.f32.mrb[7].mxu1 }
  0xfb   :  { %v551_v56 = vpack.c.bf16 %v373_v47, %v372_v23  ;;  %v389_v57 = vadd.f32 %v808_v2, %v345_v48  ;;  %v375_v34 = vadd.f32 %v808_v2, %v331_v51  ;;  %v347_v39 = vmul.f32 %v804_v1, %v289_v55 }
  0xfc   :  { %v390_v40 = vadd.f32 %v806_v63, %v346_v54 }
  0xfd   :  { %501 = vst.msk [vmem:[%s962_s4 + $0x10] sm:$0xff] %vm819_vm3, %v551_v56  ;;  %v559_v42 = vpack.c.bf16 %v389_v57, %v388_v52  ;;  %v552_v37 = vpack.c.bf16 %v375_v34, %v374_v53  ;;  %v391_v49 = vadd.f32 %v808_v2, %v347_v39  ;;  %v253_v58 = vpop.f32.mrb[8].mxu0 }
  0xfe   :  { %v332_v59 = vmul.f32 %v802_v62, %v253_v58  ;;  %v255_v60 = vpop.f32.mrb[9].mxu0 }
  0xff   :  { %509 = vst.msk [vmem:[%s962_s4 + $0x50] sm:$0xff] %vm819_vm3, %v559_v42  ;;  %502 = vst.msk [vmem:[%s962_s4 + $0x18] sm:$0xff] %vm819_vm3, %v552_v37  ;;  %v560_v61 = vpack.c.bf16 %v391_v49, %v390_v40  ;;  %v293_v0 = vpop.f32.mrb[8].mxu1  ;;  %v333_v3 = vmul.f32 %v804_v1, %v255_v60  ;;  %v257_v4 = vpop.f32.mrb[10].mxu0 }
 0x100   :  { %v376_v5 = vadd.f32 %v806_v63, %v332_v59  ;;  %v348_v6 = vmul.f32 %v802_v62, %v293_v0  ;;  %v295_v7 = vpop.f32.mrb[9].mxu1  ;;  %v334_v8 = vmul.f32 %v802_v62, %v257_v4  ;;  %v259_v9 = vpop.f32.mrb[11].mxu0 }
 0x101   :  { %510 = vst.msk [vmem:[%s962_s4 + $0x58] sm:$0xff] %vm819_vm3, %v560_v61  ;;  %v377_v10 = vadd.f32 %v808_v2, %v333_v3  ;;  %v349_v11 = vmul.f32 %v804_v1, %v295_v7  ;;  %v297_v12 = vpop.f32.mrb[10].mxu1  ;;  %v335_v13 = vmul.f32 %v804_v1, %v259_v9 }
 0x102   :  { %v392_v14 = vadd.f32 %v806_v63, %v348_v6  ;;  %v378_v15 = vadd.f32 %v806_v63, %v334_v8  ;;  %v350_v16 = vmul.f32 %v802_v62, %v297_v12  ;;  %v299_v17 = vpop.f32.mrb[11].mxu1 }
 0x103   :  { %v553_v19 = vpack.c.bf16 %v377_v10, %v376_v5  ;;  %v393_v20 = vadd.f32 %v808_v2, %v349_v11  ;;  %v379_v21 = vadd.f32 %v808_v2, %v335_v13  ;;  %v351_v22 = vmul.f32 %v804_v1, %v299_v17 }
 0x104   :  { %v394_v24 = vadd.f32 %v806_v63, %v350_v16 }
 0x105   :  { %503 = vst.msk [vmem:[%s962_s4 + $0x20] sm:$0xff] %vm819_vm3, %v553_v19  ;;  %v561_v26 = vpack.c.bf16 %v393_v20, %v392_v14  ;;  %v554_v27 = vpack.c.bf16 %v379_v21, %v378_v15  ;;  %v395_v28 = vadd.f32 %v808_v2, %v351_v22  ;;  %v263_v33 = vpop.f32.mrb[12].mxu0 }
 0x106   :  { %v336_v35 = vmul.f32 %v802_v62, %v263_v33  ;;  %v265_v36 = vpop.f32.mrb[13].mxu0 }
 0x107   :  { %511 = vst.msk [vmem:[%s962_s4 + $0x60] sm:$0xff] %vm819_vm3, %v561_v26  ;;  %504 = vst.msk [vmem:[%s962_s4 + $0x28] sm:$0xff] %vm819_vm3, %v554_v27  ;;  %v562_v38 = vpack.c.bf16 %v395_v28, %v394_v24  ;;  %v303_v41 = vpop.f32.mrb[12].mxu1  ;;  %v337_v43 = vmul.f32 %v804_v1, %v265_v36  ;;  %v267_v44 = vpop.f32.mrb[14].mxu0 }
 0x108   :  { %v380_v29 = vadd.f32 %v806_v63, %v336_v35  ;;  %v352_v45 = vmul.f32 %v802_v62, %v303_v41  ;;  %v305_v46 = vpop.f32.mrb[13].mxu1  ;;  %v338_v23 = vmul.f32 %v802_v62, %v267_v44  ;;  %v269_v30 = vpop.f32.mrb[15].mxu0 }
 0x109   :  { %512 = vst.msk [vmem:[%s962_s4 + $0x68] sm:$0xff] %vm819_vm3, %v562_v38  ;;  %v381_v31 = vadd.f32 %v808_v2, %v337_v43  ;;  %v353_v25 = vmul.f32 %v804_v1, %v305_v46  ;;  %v307_v32 = vpop.f32.mrb[14].mxu1  ;;  %v339_v47 = vmul.f32 %v804_v1, %v269_v30 }
 0x10a   :  { %v396_v48 = vadd.f32 %v806_v63, %v352_v45  ;;  %v382_v50 = vadd.f32 %v806_v63, %v338_v23  ;;  %v354_v51 = vmul.f32 %v802_v62, %v307_v32  ;;  %v309_v52 = vpop.f32.mrb[15].mxu1 }
 0x10b   :  { %v555_v53 = vpack.c.bf16 %v381_v31, %v380_v29  ;;  %v397_v54 = vadd.f32 %v808_v2, %v353_v25  ;;  %v383_v55 = vadd.f32 %v808_v2, %v339_v47  ;;  %v355_v56 = vmul.f32 %v804_v1, %v309_v52 }
 0x10c   :  { %v398_v57 = vadd.f32 %v806_v63, %v354_v51 }
 0x10d   :  { %505 = vst.msk [vmem:[%s962_s4 + $0x30] sm:$0xff] %vm819_vm3, %v555_v53  ;;  %v563_v34 = vpack.c.bf16 %v397_v54, %v396_v48  ;;  %v556_v39 = vpack.c.bf16 %v383_v55, %v382_v50  ;;  %v399_v62 = vadd.f32 %v808_v2, %v355_v56 }
 0x10f   :  { %513 = vst.msk [vmem:[%s962_s4 + $0x70] sm:$0xff] %vm819_vm3, %v563_v34  ;;  %506 = vst.msk [vmem:[%s962_s4 + $0x38] sm:$0xff] %vm819_vm3, %v556_v39  ;;  %v564_v1 = vpack.c.bf16 %v399_v62, %v398_v57 }
 0x111   :  { %514 = vst.msk [vmem:[%s962_s4 + $0x78] sm:$0xff] %vm819_vm3, %v564_v1 }

</bundles_post_ra>
